<compile_context>
chip_gen: v5e
topology: v5e:2x2
jax: 0.10.0
libtpu: 0.0.40
codegen_flags: <defaults>
</compile_context>

<pallas_src>
import functools
import math

import jax
import jax.numpy as jnp
from jax.experimental import pallas as pl
from jax.experimental.pallas import tpu as pltpu

_LANE = 128      # lane width: matmul-operand last-dim padding target
_SUBLANE = 8     # sublane width: batch-dim padding target


def _round_up(x, m):
    return ((x + m - 1) // m) * m


def _cdiv(a, b):
    return (a + b - 1) // b


def _vmem_capacity_bytes():
    """Physical VMEM per TensorCore (generation-aware), with a safe fallback."""
    try:
        return int(pltpu.get_tpu_info().vmem_capacity_bytes)
    except Exception:
        return 64 << 20   # v7x per-TC size: safe lower bound on every generation


def _const_block_spec(shape, single_buffer):
    """Spec for a grid-invariant operand (weights/bias). Single-buffered if supported."""
    if single_buffer:
        try:
            return pl.BlockSpec(shape, lambda i: (0, 0), pipeline_mode=pl.Buffered(1))
        except (TypeError, ValueError, AttributeError):
            pass
    return pl.BlockSpec(shape, lambda i: (0, 0))


def _fused_linear_block_kernel(*refs, num_layers, relu_flags, out_widths, compute_dtype):
    """One grid step = one batch tile pushed through the entire Linear(+ReLU) stack.

    refs layout: (x, w0, b0, w1, b1, ..., o0, o1, ...).
    The activation chain stays in vregs/VMEM across layers; each layer's embedding is
    written back at its true logical width in bf16.
    """
    x_ref = refs[0]
    w_refs = [refs[1 + 2 * i] for i in range(num_layers)]
    b_refs = [refs[2 + 2 * i] for i in range(num_layers)]
    o_refs = refs[1 + 2 * num_layers:]

    act = x_ref[...].astype(compute_dtype)
    for i in range(num_layers):
        # bf16 x bf16 MXU matmul with f32 accumulation.
        acc = jnp.dot(act, w_refs[i][...], preferred_element_type=jnp.float32)
        acc = acc + b_refs[i][...]                 # f32 bias-add / ReLU on the VPU
        if relu_flags[i]:
            acc = jnp.maximum(acc, 0.0)
        # Store only the logical columns (block spans the full output last dim).
        o_refs[i][...] = acc[:, :out_widths[i]].astype(o_refs[i].dtype)
        if i + 1 < num_layers:
            act = acc.astype(compute_dtype)        # padded cols are exactly 0


# Lazily probed: does this JAX accept pl.Buffered(1) on pallas_call BlockSpecs?
_SINGLE_BUFFER_OK = None


def fused_linear_block(x, weights_padded, biases_padded, out_dims, relu_flags, *,
                       compute_dtype=jnp.bfloat16, store_dtype=jnp.bfloat16,
                       out_dtype=jnp.float32, tile_m=256):
    """Run the whole LinearBlock stack in one fused Pallas kernel.

    Args:
      x:               (M, K0) float array (unpadded).
      weights_padded:  list of (K_i_pad, K_{i+1}_pad) compute_dtype arrays (zero-padded
                       to multiples of 128; stored (in, out), i.e. transposed vs torch).
      biases_padded:   list of (1, K_{i+1}_pad) f32 arrays, zero-padded.
      out_dims:        logical output width per layer.
      relu_flags:      tuple of bools, one per layer.
    Returns a list of per-layer embeddings, each (M, out_dims[i]) in out_dtype.
    """
    global _SINGLE_BUFFER_OK
    num_layers = len(weights_padded)
    M, K0 = x.shape
    dims_pad = [weights_padded[0].shape[0]] + [w.shape[1] for w in weights_padded]
    assert dims_pad[0] >= K0
    out_dims = [int(d) for d in out_dims]

    # ---- batch tiling (megacore-aware: aim for >= 2 grid tiles when batch allows) ----
    M_pad8 = _round_up(M, _SUBLANE)
    tm = max(_SUBLANE, min(tile_m, M_pad8))
    if M_pad8 >= 2 * _SUBLANE:
        tm = min(tm, _round_up(_cdiv(M_pad8, 2), _SUBLANE))

    # ---- generation-aware VMEM budget + explicit whole-stack residency check ----
    cbytes = jnp.dtype(compute_dtype).itemsize
    sbytes = jnp.dtype(store_dtype).itemsize
    xbytes = x.dtype.itemsize
    w_resident = sum(dims_pad[i] * dims_pad[i + 1] for i in range(num_layers)) * cbytes
    b_resident = sum(_SUBLANE * dims_pad[i + 1] for i in range(num_layers)) * 4

    def vmem_needed(tm_, w_bufs=2):   # account conservatively with 2 weight buffers
        n = w_bufs * (w_resident + b_resident)
        n += 2 * tm_ * dims_pad[0] * xbytes                                    # x blocks
        n += 2 * sum(tm_ * _round_up(d, _LANE) for d in out_dims) * sbytes      # out blocks
        return n

    budget = int(0.80 * _vmem_capacity_bytes())
    while vmem_needed(tm) > budget and tm > _SUBLANE:
        tm = max(_SUBLANE, _round_up(tm // 2, _SUBLANE))
    if vmem_needed(tm) > budget:
        # TODO(synk): split the stack across multiple pallas_calls (or add a K-reduction
        # grid axis with an f32 scratch accumulator) when the whole weight stack cannot
        # stay VMEM-resident (relevant for very wide layers on v7x's 64 MiB/TC).
        raise ValueError("LinearBlock weight stack does not fit in the VMEM budget.")

    M_pad = _round_up(M_pad8, tm)
    grid = (M_pad // tm,)

    # ---- input padding only when actually needed (bf16 cast happens in-kernel) ----
    if M_pad != M or dims_pad[0] != K0:
        x_in = jnp.pad(x, ((0, M_pad - M), (0, dims_pad[0] - K0)))
    else:
        x_in = x

    vmem_limit = int(min(budget, max(2 * vmem_needed(tm), 4 << 20)))

    # Advisory cost estimate for the XLA scheduler.
    flops = 2 * M_pad * sum(dims_pad[i] * dims_pad[i + 1] for i in range(num_layers))
    bytes_accessed = int(x_in.size) * xbytes
    bytes_accessed += sum(int(w.size) * w.dtype.itemsize for w in weights_padded)
    bytes_accessed += sum(int(b.size) * b.dtype.itemsize for b in biases_padded)
    bytes_accessed += sum(M_pad * d * sbytes for d in out_dims)
    cost = pl.CostEstimate(flops=flops, transcendentals=0, bytes_accessed=bytes_accessed)

    kernel = functools.partial(
        _fused_linear_block_kernel,
        num_layers=num_layers,
        relu_flags=tuple(bool(f) for f in relu_flags),
        out_widths=tuple(out_dims),
        compute_dtype=compute_dtype,
    )

    ops = [x_in]
    for li in range(num_layers):
        ops.append(weights_padded[li])
        ops.append(biases_padded[li])

    def build(single_buffer_weights):
        in_specs = [pl.BlockSpec((tm, dims_pad[0]), lambda i: (i, 0))]
        for li in range(num_layers):
            in_specs.append(_const_block_spec((dims_pad[li], dims_pad[li + 1]),
                                              single_buffer_weights))
            in_specs.append(_const_block_spec((1, dims_pad[li + 1]),
                                              single_buffer_weights))
        out_specs = [pl.BlockSpec((tm, out_dims[li]), lambda i: (i, 0))
                     for li in range(num_layers)]
        out_shape = [jax.ShapeDtypeStruct((M_pad, out_dims[li]), store_dtype)
                     for li in range(num_layers)]
        return pl.pallas_call(
            kernel,
            out_shape=out_shape,
            grid=grid,
            in_specs=in_specs,
            out_specs=out_specs,
            compiler_params=pltpu.CompilerParams(
                dimension_semantics=("parallel",),   # batch tiles are independent
                vmem_limit_bytes=vmem_limit,
            ),
            cost_estimate=cost,
        )

    if _SINGLE_BUFFER_OK is None:
        try:
            outs = jax.block_until_ready(build(True)(*ops))
            _SINGLE_BUFFER_OK = True
        except Exception:
            _SINGLE_BUFFER_OK = False
            outs = build(False)(*ops)
    else:
        outs = build(_SINGLE_BUFFER_OK)(*ops)

    # Strip batch padding; upcast for callers that expect f32 embeddings.
    return [outs[li][:M].astype(out_dtype) for li in range(num_layers)]


class LinearBlockPallas:
    """JAX/Pallas port of model_affinity.models_TCCL.LinearBlock (forward, eval mode)."""

    def __init__(self, linear_layers_dim, dropout_rate=0.0,
                 relu_layers_index=(), dropout_layers_index=(), seed=0,
                 compute_dtype=jnp.bfloat16, tile_m=256):
        num_layers = len(linear_layers_dim) - 1
        self.relu_layers_index = set(relu_layers_index)
        self.dropout_layers_index = set(dropout_layers_index)
        self.dropout_rate = dropout_rate
        self.relu_flags = tuple(i in self.relu_layers_index for i in range(num_layers))
        self.compute_dtype = compute_dtype
        self.tile_m = tile_m
        self.dims = list(linear_layers_dim)
        self.dims_pad = [_round_up(d, _LANE) for d in self.dims]

        # Master params in f32 with PyTorch nn.Linear default init:
        # U(-1/sqrt(fan_in), 1/sqrt(fan_in)); weights stored (in, out).
        self.weights = []
        self.biases = []
        key = jax.random.PRNGKey(seed)
        for i in range(num_layers):
            fan_in, fan_out = self.dims[i], self.dims[i + 1]
            key, kw, kb = jax.random.split(key, 3)
            bound = 1.0 / math.sqrt(fan_in)
            self.weights.append(
                jax.random.uniform(kw, (fan_in, fan_out), jnp.float32, -bound, bound))
            self.biases.append(
                jax.random.uniform(kb, (1, fan_out), jnp.float32, -bound, bound))

        # Pre-padded / pre-cast kernel operands (done once, not per forward call).
        self.weights_padded = []
        self.biases_padded = []
        for i in range(num_layers):
            w_p = jnp.zeros((self.dims_pad[i], self.dims_pad[i + 1]), compute_dtype)
            w_p = w_p.at[:self.dims[i], :self.dims[i + 1]].set(
                self.weights[i].astype(compute_dtype))
            b_p = jnp.zeros((1, self.dims_pad[i + 1]), jnp.float32)
            b_p = b_p.at[:, :self.dims[i + 1]].set(self.biases[i])
            self.weights_padded.append(w_p)
            self.biases_padded.append(b_p)

    def __call__(self, x):
        # Dropout: identity for rate=0.0 / eval mode (matches the module default).
        return fused_linear_block(
            x, self.weights_padded, self.biases_padded,
            out_dims=self.dims[1:], relu_flags=self.relu_flags,
            compute_dtype=self.compute_dtype, tile_m=self.tile_m)


def _reference_bf16(x, block):
    """Plain-JAX reference using the same bf16-compute / f32-accumulate recipe."""
    out = x.astype(block.compute_dtype)
    embs = []
    for i, (w, b) in enumerate(zip(block.weights, block.biases)):
        acc = jnp.dot(out, w.astype(block.compute_dtype),
                      preferred_element_type=jnp.float32)
        acc = acc + b
        if block.relu_flags[i]:
            acc = jnp.maximum(acc, 0.0)
        embs.append(acc)
        out = acc.astype(block.compute_dtype)
    return embs


def _reference_f32(x, block):
    """Full-f32 reference (loose tolerance check for the bf16 compute path)."""
    out = x
    embs = []
    for i, (w, b) in enumerate(zip(block.weights, block.biases)):
        out = out @ w + b
        if block.relu_flags[i]:
            out = jnp.maximum(out, 0.0)
        embs.append(out)
    return embs


if __name__ == "__main__":
    # Small shapes consistent with the module: batch=8, dims [32, 64, 16], ReLU after layer 0.
    linear_layers_dim = [32, 64, 16]
    relu_layers_index = [0]
    block = LinearBlockPallas(linear_layers_dim,
                              dropout_rate=0.0,
                              relu_layers_index=relu_layers_index,
                              dropout_layers_index=[],
                              seed=0)

    key = jax.random.PRNGKey(0)
    x = jax.random.normal(key, (8, linear_layers_dim[0]), dtype=jnp.float32)

    embeddings = block(x)
    embeddings = [jax.block_until_ready(e) for e in embeddings]

    # Check vs. a reference using the identical bf16/f32-acc compute recipe
    # (tolerance covers the bf16 HBM writeback rounding of the kernel outputs).
    refs = _reference_bf16(x, block)
    for e, r in zip(embeddings, refs):
        assert e.shape == r.shape
        assert jnp.allclose(e, r, atol=2e-2, rtol=2e-2), "mismatch vs bf16 reference"

    # Loose check vs. the pure-f32 reference (bf16 inputs => ~1e-2 relative error expected).
    refs32 = _reference_f32(x, block)
    for e, r in zip(embeddings, refs32):
        assert jnp.allclose(e, r, atol=5e-2, rtol=5e-2), "mismatch vs f32 reference"

    print("KERNEL_OK")
</pallas_src>

<mosaic_0001>
module attributes {stable_mosaic.version = 11 : i64} {
  func.func @_fused_linear_block_kernel(%arg0: i32, %arg1: memref<8x128xf32, #tpu.memory_space<vmem>>, %arg2: memref<128x128xbf16, #tpu.memory_space<vmem>>, %arg3: memref<1x128xf32, #tpu.memory_space<vmem>>, %arg4: memref<128x128xbf16, #tpu.memory_space<vmem>>, %arg5: memref<1x128xf32, #tpu.memory_space<vmem>>, %arg6: memref<8x64xbf16, #tpu.memory_space<vmem>>, %arg7: memref<8x16xbf16, #tpu.memory_space<vmem>>) attributes {dimension_semantics = [#tpu.dimension_semantics<parallel>], iteration_bounds = array<i64: 1>, scalar_prefetch = 0 : i64, scratch_operands = 0 : i64, tpu.core_type = #tpu.core_type<tc>, window_params = [{transform_indices = @transform_0, window_bounds = array<i64: 8, 128>}, {pipeline_mode = #tpu.pipeline_mode<synchronous>, transform_indices = @transform_1, window_bounds = array<i64: 128, 128>}, {pipeline_mode = #tpu.pipeline_mode<synchronous>, transform_indices = @transform_2, window_bounds = array<i64: 1, 128>}, {pipeline_mode = #tpu.pipeline_mode<synchronous>, transform_indices = @transform_3, window_bounds = array<i64: 128, 128>}, {pipeline_mode = #tpu.pipeline_mode<synchronous>, transform_indices = @transform_4, window_bounds = array<i64: 1, 128>}, {transform_indices = @transform_5, window_bounds = array<i64: 8, 64>}, {transform_indices = @transform_6, window_bounds = array<i64: 8, 16>}]} {
    %c0 = arith.constant 0 : index
    %c0_0 = arith.constant 0 : index
    %0 = vector.load %arg1[%c0, %c0_0] : memref<8x128xf32, #tpu.memory_space<vmem>>, vector<8x128xf32>
    %1 = arith.truncf %0 : vector<8x128xf32> to vector<8x128xbf16>
    %c0_1 = arith.constant 0 : index
    %c0_2 = arith.constant 0 : index
    %2 = vector.load %arg2[%c0_1, %c0_2] : memref<128x128xbf16, #tpu.memory_space<vmem>>, vector<128x128xbf16>
    %cst = arith.constant dense<0.000000e+00> : vector<8x128xf32>
    %3 = tpu.matmul %1, %2, %cst {dimension_numbers = #tpu.dot_dimension_numbers<[1], [0], [0], [1], [0, 0, 1, 1], [], []>} : vector<8x128xbf16>, vector<128x128xbf16>, vector<8x128xf32> -> vector<8x128xf32>
    %c0_3 = arith.constant 0 : index
    %c0_4 = arith.constant 0 : index
    %4 = vector.load %arg3[%c0_3, %c0_4] : memref<1x128xf32, #tpu.memory_space<vmem>>, vector<1x128xf32>
    %5 = vector.broadcast %4 : vector<1x128xf32> to vector<8x128xf32>
    %6 = arith.addf %3, %5 : vector<8x128xf32>
    %cst_5 = arith.constant 0.000000e+00 : f32
    %7 = vector.broadcast %cst_5 : f32 to vector<8x128xf32>
    %8 = arith.maximumf %6, %7 : vector<8x128xf32>
    %9 = vector.extract_strided_slice %8 {offsets = [0, 0], sizes = [8, 64], strides = [1, 1]} : vector<8x128xf32> to vector<8x64xf32>
    %10 = arith.truncf %9 : vector<8x64xf32> to vector<8x64xbf16>
    %c0_6 = arith.constant 0 : index
    %c0_7 = arith.constant 0 : index
    %11 = vector.load %arg6[%c0_6, %c0_7] : memref<8x64xbf16, #tpu.memory_space<vmem>>, vector<8x64xbf16>
    tpu.vector_store %arg6[%c0_6, %c0_7], %10 {strides = array<i32>} : memref<8x64xbf16, #tpu.memory_space<vmem>>, vector<8x64xbf16>,
    %12 = arith.truncf %8 : vector<8x128xf32> to vector<8x128xbf16>
    %c0_8 = arith.constant 0 : index
    %c0_9 = arith.constant 0 : index
    %13 = vector.load %arg4[%c0_8, %c0_9] : memref<128x128xbf16, #tpu.memory_space<vmem>>, vector<128x128xbf16>
    %cst_10 = arith.constant dense<0.000000e+00> : vector<8x128xf32>
    %14 = tpu.matmul %12, %13, %cst_10 {dimension_numbers = #tpu.dot_dimension_numbers<[1], [0], [0], [1], [0, 0, 1, 1], [], []>} : vector<8x128xbf16>, vector<128x128xbf16>, vector<8x128xf32> -> vector<8x128xf32>
    %c0_11 = arith.constant 0 : index
    %c0_12 = arith.constant 0 : index
    %15 = vector.load %arg5[%c0_11, %c0_12] : memref<1x128xf32, #tpu.memory_space<vmem>>, vector<1x128xf32>
    %16 = vector.broadcast %15 : vector<1x128xf32> to vector<8x128xf32>
    %17 = arith.addf %14, %16 : vector<8x128xf32>
    %18 = vector.extract_strided_slice %17 {offsets = [0, 0], sizes = [8, 16], strides = [1, 1]} : vector<8x128xf32> to vector<8x16xf32>
    %19 = arith.truncf %18 : vector<8x16xf32> to vector<8x16xbf16>
    %c0_13 = arith.constant 0 : index
    %c0_14 = arith.constant 0 : index
    %20 = vector.load %arg7[%c0_13, %c0_14] : memref<8x16xbf16, #tpu.memory_space<vmem>>, vector<8x16xbf16>
    tpu.vector_store %arg7[%c0_13, %c0_14], %19 {strides = array<i32>} : memref<8x16xbf16, #tpu.memory_space<vmem>>, vector<8x16xbf16>,
    return
  }
  func.func @transform_0(%arg0: i32) -> (i32, i32) {
    %c0_i32 = arith.constant 0 : i32
    %c0_i32_0 = arith.constant 0 : i32
    return %arg0, %c0_i32 : i32, i32
  }
  func.func @transform_1(%arg0: i32) -> (i32, i32) {
    %c0_i32 = arith.constant 0 : i32
    %c0_i32_0 = arith.constant 0 : i32
    %c0_i32_1 = arith.constant 0 : i32
    return %c0_i32, %c0_i32_0 : i32, i32
  }
  func.func @transform_2(%arg0: i32) -> (i32, i32) {
    %c0_i32 = arith.constant 0 : i32
    %c0_i32_0 = arith.constant 0 : i32
    %c0_i32_1 = arith.constant 0 : i32
    return %c0_i32, %c0_i32_0 : i32, i32
  }
  func.func @transform_3(%arg0: i32) -> (i32, i32) {
    %c0_i32 = arith.constant 0 : i32
    %c0_i32_0 = arith.constant 0 : i32
    %c0_i32_1 = arith.constant 0 : i32
    return %c0_i32, %c0_i32_0 : i32, i32
  }
  func.func @transform_4(%arg0: i32) -> (i32, i32) {
    %c0_i32 = arith.constant 0 : i32
    %c0_i32_0 = arith.constant 0 : i32
    %c0_i32_1 = arith.constant 0 : i32
    return %c0_i32, %c0_i32_0 : i32, i32
  }
  func.func @transform_5(%arg0: i32) -> (i32, i32) {
    %c0_i32 = arith.constant 0 : i32
    %c0_i32_0 = arith.constant 0 : i32
    return %arg0, %c0_i32 : i32, i32
  }
  func.func @transform_6(%arg0: i32) -> (i32, i32) {
    %c0_i32 = arith.constant 0 : i32
    %c0_i32_0 = arith.constant 0 : i32
    return %arg0, %c0_i32 : i32, i32
  }
}

module attributes {stable_mosaic.version = 11 : i64} {
  func.func @_fused_linear_block_kernel(%arg0: i32, %arg1: memref<8x128xf32, #tpu.memory_space<vmem>>, %arg2: memref<128x128xbf16, #tpu.memory_space<vmem>>, %arg3: memref<1x128xf32, #tpu.memory_space<vmem>>, %arg4: memref<128x128xbf16, #tpu.memory_space<vmem>>, %arg5: memref<1x128xf32, #tpu.memory_space<vmem>>, %arg6: memref<8x64xbf16, #tpu.memory_space<vmem>>, %arg7: memref<8x16xbf16, #tpu.memory_space<vmem>>) attributes {dimension_semantics = [#tpu.dimension_semantics<parallel>], iteration_bounds = array<i64: 1>, scalar_prefetch = 0 : i64, scratch_operands = 0 : i64, tpu.core_type = #tpu.core_type<tc>, window_params = [{transform_indices = @transform_0, window_bounds = array<i64: 8, 128>}, {pipeline_mode = #tpu.pipeline_mode<synchronous>, transform_indices = @transform_1, window_bounds = array<i64: 128, 128>}, {pipeline_mode = #tpu.pipeline_mode<synchronous>, transform_indices = @transform_2, window_bounds = array<i64: 1, 128>}, {pipeline_mode = #tpu.pipeline_mode<synchronous>, transform_indices = @transform_3, window_bounds = array<i64: 128, 128>}, {pipeline_mode = #tpu.pipeline_mode<synchronous>, transform_indices = @transform_4, window_bounds = array<i64: 1, 128>}, {transform_indices = @transform_5, window_bounds = array<i64: 8, 64>}, {transform_indices = @transform_6, window_bounds = array<i64: 8, 16>}]} {
    %c0 = arith.constant 0 : index
    %c0_0 = arith.constant 0 : index
    %0 = vector.load %arg1[%c0, %c0_0] : memref<8x128xf32, #tpu.memory_space<vmem>>, vector<8x128xf32>
    %1 = arith.truncf %0 : vector<8x128xf32> to vector<8x128xbf16>
    %c0_1 = arith.constant 0 : index
    %c0_2 = arith.constant 0 : index
    %2 = vector.load %arg2[%c0_1, %c0_2] : memref<128x128xbf16, #tpu.memory_space<vmem>>, vector<128x128xbf16>
    %cst = arith.constant dense<0.000000e+00> : vector<8x128xf32>
    %3 = tpu.matmul %1, %2, %cst {dimension_numbers = #tpu.dot_dimension_numbers<[1], [0], [0], [1], [0, 0, 1, 1], [], []>} : vector<8x128xbf16>, vector<128x128xbf16>, vector<8x128xf32> -> vector<8x128xf32>
    %c0_3 = arith.constant 0 : index
    %c0_4 = arith.constant 0 : index
    %4 = vector.load %arg3[%c0_3, %c0_4] : memref<1x128xf32, #tpu.memory_space<vmem>>, vector<1x128xf32>
    %5 = vector.broadcast %4 : vector<1x128xf32> to vector<8x128xf32>
    %6 = arith.addf %3, %5 : vector<8x128xf32>
    %cst_5 = arith.constant 0.000000e+00 : f32
    %7 = vector.broadcast %cst_5 : f32 to vector<8x128xf32>
    %8 = arith.maximumf %6, %7 : vector<8x128xf32>
    %9 = vector.extract_strided_slice %8 {offsets = [0, 0], sizes = [8, 64], strides = [1, 1]} : vector<8x128xf32> to vector<8x64xf32>
    %10 = arith.truncf %9 : vector<8x64xf32> to vector<8x64xbf16>
    %c0_6 = arith.constant 0 : index
    %c0_7 = arith.constant 0 : index
    %11 = vector.load %arg6[%c0_6, %c0_7] : memref<8x64xbf16, #tpu.memory_space<vmem>>, vector<8x64xbf16>
    tpu.vector_store %arg6[%c0_6, %c0_7], %10 {strides = array<i32>} : memref<8x64xbf16, #tpu.memory_space<vmem>>, vector<8x64xbf16>,
    %12 = arith.truncf %8 : vector<8x128xf32> to vector<8x128xbf16>
    %c0_8 = arith.constant 0 : index
    %c0_9 = arith.constant 0 : index
    %13 = vector.load %arg4[%c0_8, %c0_9] : memref<128x128xbf16, #tpu.memory_space<vmem>>, vector<128x128xbf16>
    %cst_10 = arith.constant dense<0.000000e+00> : vector<8x128xf32>
    %14 = tpu.matmul %12, %13, %cst_10 {dimension_numbers = #tpu.dot_dimension_numbers<[1], [0], [0], [1], [0, 0, 1, 1], [], []>} : vector<8x128xbf16>, vector<128x128xbf16>, vector<8x128xf32> -> vector<8x128xf32>
    %c0_11 = arith.constant 0 : index
    %c0_12 = arith.constant 0 : index
    %15 = vector.load %arg5[%c0_11, %c0_12] : memref<1x128xf32, #tpu.memory_space<vmem>>, vector<1x128xf32>
    %16 = vector.broadcast %15 : vector<1x128xf32> to vector<8x128xf32>
    %17 = arith.addf %14, %16 : vector<8x128xf32>
    %18 = vector.extract_strided_slice %17 {offsets = [0, 0], sizes = [8, 16], strides = [1, 1]} : vector<8x128xf32> to vector<8x16xf32>
    %19 = arith.truncf %18 : vector<8x16xf32> to vector<8x16xbf16>
    %c0_13 = arith.constant 0 : index
    %c0_14 = arith.constant 0 : index
    %20 = vector.load %arg7[%c0_13, %c0_14] : memref<8x16xbf16, #tpu.memory_space<vmem>>, vector<8x16xbf16>
    tpu.vector_store %arg7[%c0_13, %c0_14], %19 {strides = array<i32>} : memref<8x16xbf16, #tpu.memory_space<vmem>>, vector<8x16xbf16>,
    return
  }
  func.func @transform_0(%arg0: i32) -> (i32, i32) {
    %c0_i32 = arith.constant 0 : i32
    %c0_i32_0 = arith.constant 0 : i32
    return %arg0, %c0_i32 : i32, i32
  }
  func.func @transform_1(%arg0: i32) -> (i32, i32) {
    %c0_i32 = arith.constant 0 : i32
    %c0_i32_0 = arith.constant 0 : i32
    %c0_i32_1 = arith.constant 0 : i32
    return %c0_i32, %c0_i32_0 : i32, i32
  }
  func.func @transform_2(%arg0: i32) -> (i32, i32) {
    %c0_i32 = arith.constant 0 : i32
    %c0_i32_0 = arith.constant 0 : i32
    %c0_i32_1 = arith.constant 0 : i32
    return %c0_i32, %c0_i32_0 : i32, i32
  }
  func.func @transform_3(%arg0: i32) -> (i32, i32) {
    %c0_i32 = arith.constant 0 : i32
    %c0_i32_0 = arith.constant 0 : i32
    %c0_i32_1 = arith.constant 0 : i32
    return %c0_i32, %c0_i32_0 : i32, i32
  }
  func.func @transform_4(%arg0: i32) -> (i32, i32) {
    %c0_i32 = arith.constant 0 : i32
    %c0_i32_0 = arith.constant 0 : i32
    %c0_i32_1 = arith.constant 0 : i32
    return %c0_i32, %c0_i32_0 : i32, i32
  }
  func.func @transform_5(%arg0: i32) -> (i32, i32) {
    %c0_i32 = arith.constant 0 : i32
    %c0_i32_0 = arith.constant 0 : i32
    return %arg0, %c0_i32 : i32, i32
  }
  func.func @transform_6(%arg0: i32) -> (i32, i32) {
    %c0_i32 = arith.constant 0 : i32
    %c0_i32_0 = arith.constant 0 : i32
    return %arg0, %c0_i32 : i32, i32
  }
}

</mosaic_0001>

<bundles_post_ra>
// kernel: tpu_custom_call.1
= control target key start
LH: loop header
LB: loop body
LE: loop exit
PB: predicated region body
PF: predicated region fallthrough
CT: control target
= control target key end

     0   :  { %12 = vsyncpa [#allocation3], 0  ;;  %s554_s0 = inlined_call_operand.hbm [shape: f32[8,128], index: 0, kind: input, shape index: {}]   ;;  %s555_s1 = inlined_call_operand.hbm [shape: bf16[128,128], index: 1, kind: input, shape index: {}]   ;;  %s556_s2 = inlined_call_operand.vmem [shape: f32[1,128], index: 2, kind: input, shape index: {}]   ;;  %s557_s3 = inlined_call_operand.hbm [shape: bf16[128,128], index: 3, kind: input, shape index: {}]   ;;  %s558_s4 = inlined_call_operand.vmem [shape: f32[1,128], index: 4, kind: input, shape index: {}]   ;;  %s559_s5 = inlined_call_operand.hbm [shape: bf16[8,64], index: 5, kind: output, shape index: {0}]   ;;  %s560_s6 = inlined_call_operand.hbm [shape: bf16[8,16], index: 6, kind: output, shape index: {1}]  }
   0x1   :  { %13 = vsyncpa [#allocation6], 0 }
   0x2   :  { %14 = vsyncpa [#allocation4], 0  ;;  %s31_s23 = sshll.u32 %s555_s1, 4  ;;  %s32_s23 = int_to_ptr.hbm [resolvable:$true] %s31_s23 }
   0x3   :  { %15 = vsyncpa [#allocation10], 0  ;;  %s491_s24 = smov [#allocation5]   ;;  %s21_s28 = sshll.u32 %s554_s0, 4  ;;  %s22_s28 = int_to_ptr.hbm [resolvable:$true] %s21_s28 }
   0x4   :  { %s33_s25 = sshll.u32 %s491_s24, 4  ;;  %s492_s29 = smov 64   ;;  %s34_s25 = int_to_ptr.vmem [resolvable:$true] %s33_s25 }
   0x5   :  { %s493_s30 = smov 4   ;;  %s494_s7 = smov [#allocation2]  }
   0x6   :  { %39 = dma.hbm_to_vmem [thread:$0]  %s32_s23, 1024, %s34_s25, [#allocation6], %s492_s29, %s492_s29, %s493_s30  }
   0x7   :  { %s23_s8 = sshll.u32 %s494_s7, 4  ;;  %s46_s11 = sshll.u32 %s557_s3, 4  ;;  %s24_s8 = int_to_ptr.vmem [resolvable:$true] %s23_s8  ;;  %s47_s11 = int_to_ptr.hbm [resolvable:$true] %s46_s11 }
   0x8   :  { %26 = dma.hbm_to_vmem [thread:$0]  %s22_s28, 128, %s24_s8, [#allocation3]  }
   0x9   :  { %s495_s1 = smov [#allocation7]  }
   0xa   :  { %s48_s12 = sshll.u32 %s495_s1, 4  ;;  %s49_s12 = int_to_ptr.vmem [resolvable:$true] %s48_s12 }
   0xb   :  { %54 = dma.hbm_to_vmem [thread:$0]  %s47_s11, 1024, %s49_s12, [#allocation6], %s492_s29, %s492_s29, %s493_s30  }
   0xc   :  { %483 = dma.done.wait [#allocation3], 128  }
   0xd   :  { %484 = vsyncadd [#allocation3], 4294967168 }
   0xe   :  { %485 = dma.done.wait [#allocation6], 2048  }
   0xf   :  { %486 = vsyncadd [#allocation6], 4294965248  ;;  %v345_v0 = vld [vmem:[#allocation5 + $0x38] sm:$0xff]  ;;  %v344_v1 = vld [vmem:[#allocation5 + $0x30] sm:$0xff]  ;;  %vm154_vm0 = vcmask 519168   ;;  %s496_s13 = smov [#allocation8]  }
  0x10   :  { %139 = vmatpush.bf16.msra.mxu0 %v345_v0  ;;  %v353_v2 = vld [vmem:[#allocation7 + $0x38] sm:$0xff]  ;;  %v352_v3 = vld [vmem:[#allocation7 + $0x30] sm:$0xff]  ;;  %v343_v4 = vld [vmem:[#allocation5 + $0x28] sm:$0xff]  ;;  %s245_s14 = sshll.u32 %s496_s13, 4  ;;  %s247_s17 = sshll.u32 %s559_s5, 4  ;;  %vm238_vm1 = vcmask 125952   ;;  %s246_s14 = int_to_ptr.vmem [resolvable:$true] %s245_s14  ;;  %s248_s17 = int_to_ptr.hbm [resolvable:$true] %s247_s17 }
  0x11   :  { %224 = vmatpush.bf16.msra.mxu1 %v353_v2  ;;  %v351_v5 = vld [vmem:[#allocation7 + $0x28] sm:$0xff]  ;;  %v342_v6 = vld [vmem:[#allocation5 + $0x20] sm:$0xff]  ;;  %v341_v8 = vld [vmem:[#allocation5 + $0x18] sm:$0xff]  ;;  %s258_s23 = sshll.u32 %s560_s6, 4  ;;  %s259_s23 = int_to_ptr.hbm [resolvable:$true] %s258_s23 }
  0x12   :  { %v350_v7 = vld [vmem:[#allocation7 + $0x20] sm:$0xff]  ;;  %v349_v9 = vld [vmem:[#allocation7 + $0x18] sm:$0xff]  ;;  %v340_v10 = vld [vmem:[#allocation5 + $0x10] sm:$0xff] }
  0x13   :  { %v348_v11 = vld [vmem:[#allocation7 + $0x10] sm:$0xff]  ;;  %v339_v12 = vld [vmem:[#allocation5 + $0x8] sm:$0xff]  ;;  %v338_v13 = vld [vmem:[#allocation5] sm:$0xff] }
  0x14   :  { %140 = vmatpush.bf16.msra.mxu0 %v344_v1  ;;  %v69_v14 = vld [vmem:[#allocation2] sm:$0xff]  ;;  %v347_v16 = vld [vmem:[#allocation7 + $0x8] sm:$0xff]  ;;  %v346_v17 = vld [vmem:[#allocation7] sm:$0xff] }
  0x15   :  { %225 = vmatpush.bf16.msra.mxu1 %v352_v3  ;;  %v70_v15 = vpack.c.bf16 %v69_v14, %v69_v14  ;;  %v361_v18 = vld [vmem:[%s556_s2] ss:$0 sm:$0xff]  ;;  %s497_s2 = smov [#allocation9]  }
  0x16   :  { %v362_v24 = vld [vmem:[%s558_s4] ss:$0 sm:$0xff]  ;;  %s256_s20 = sshll.u32 %s497_s2, 4  ;;  %s257_s20 = int_to_ptr.vmem [resolvable:$true] %s256_s20 }
  0x18   :  { %141 = vmatpush.bf16.msra.mxu0 %v343_v4 }
  0x19   :  { %226 = vmatpush.bf16.msra.mxu1 %v351_v5 }
  0x1c   :  { %142 = vmatpush.bf16.msra.mxu0 %v342_v6 }
  0x1d   :  { %227 = vmatpush.bf16.msra.mxu1 %v350_v7 }
  0x20   :  { %143 = vmatpush.bf16.msra.mxu0 %v341_v8 }
  0x21   :  { %228 = vmatpush.bf16.msra.mxu1 %v349_v9 }
  0x24   :  { %144 = vmatpush.bf16.msra.mxu0 %v340_v10 }
  0x25   :  { %229 = vmatpush.bf16.msra.mxu1 %v348_v11 }
  0x28   :  { %145 = vmatpush.bf16.msra.mxu0 %v339_v12 }
  0x29   :  { %230 = vmatpush.bf16.msra.mxu1 %v347_v16 }
  0x2c   :  { %146 = vmatpush.bf16.msra.mxu0 %v338_v13 }
  0x2d   :  { %231 = vmatpush.bf16.msra.mxu1 %v346_v17 }
  0x2f   :  { %147 = vmatmul.bf16.vlgmr.msra.gmra.mxu0 %v70_v15 }
  0xac   :  { %v148_v19 = vpop.f32.mrf.mxu0 }
  0xad   :  { %v149_v20 = vadd.f32 %v361_v18, %v148_v19 }
  0xaf   :  { %v152_v21 = vmax.f32 %v149_v20, 0.0 }
  0xb1   :  { %v153_v22 = vpack.c.bf16 %v152_v21, %v152_v21 }
  0xb3   :  { %232 = vmatmul.bf16.vlgmr.msra.gmra.mxu1 %v153_v22  ;;  %155 = vst.msk [vmem:[#allocation8] sm:$0xf] %vm154_vm0, %v153_v22 }
  0xb4   :  { %v150_v23 = vpop.f32.mrf.mxu0  ;;  %250 = dma.vmem_to_hbm [thread:$0]  %s246_s14, 64, %s248_s17, [#allocation4]  }
 0x130   :  { %v233_v25 = vpop.f32.mrf.mxu1 }
 0x131   :  { %v234_v26 = vadd.f32 %v362_v24, %v233_v25 }
 0x133   :  { %v237_v27 = vpack.c.bf16 %v234_v26, %v234_v26 }
 0x135   :  { %239 = vst.msk [vmem:[#allocation9] sm:$0xf] %vm238_vm1, %v237_v27 }
 0x136   :  { %261 = dma.vmem_to_hbm [thread:$0]  %s257_s20, 64, %s259_s23, [#allocation10]  }
 0x138   :  { %v235_v28 = vpop.f32.mrf.mxu1 }
 0x139   :  { %487 = dma.done.wait [#allocation4], 64  }
 0x13a   :  { %488 = vsyncadd [#allocation4], 4294967232 }
 0x13b   :  { %489 = dma.done.wait [#allocation10], 64  }
 0x13c   :  { %490 = vsyncadd [#allocation10], 4294967232 }
 0x13d   :  { %270 = vsyncpa [#allocation3], 1 }
 0x13e   :  { %271 = vsyncpa [#allocation6], 1 }
 0x13f   :  { %272 = vsyncpa [#allocation4], 1 }
 0x140   :  { %273 = vsyncpa [#allocation10], 1 }

// kernel: tpu_custom_call.1
= control target key start
LH: loop header
LB: loop body
LE: loop exit
PB: predicated region body
PF: predicated region fallthrough
CT: control target
= control target key end

     0   :  { %12 = vsyncpa [#allocation3], 0  ;;  %s554_s0 = inlined_call_operand.hbm [shape: f32[8,128], index: 0, kind: input, shape index: {}]   ;;  %s555_s1 = inlined_call_operand.hbm [shape: bf16[128,128], index: 1, kind: input, shape index: {}]   ;;  %s556_s2 = inlined_call_operand.vmem [shape: f32[1,128], index: 2, kind: input, shape index: {}]   ;;  %s557_s3 = inlined_call_operand.hbm [shape: bf16[128,128], index: 3, kind: input, shape index: {}]   ;;  %s558_s4 = inlined_call_operand.vmem [shape: f32[1,128], index: 4, kind: input, shape index: {}]   ;;  %s559_s5 = inlined_call_operand.hbm [shape: bf16[8,64], index: 5, kind: output, shape index: {0}]   ;;  %s560_s6 = inlined_call_operand.hbm [shape: bf16[8,16], index: 6, kind: output, shape index: {1}]  }
   0x1   :  { %13 = vsyncpa [#allocation6], 0 }
   0x2   :  { %14 = vsyncpa [#allocation4], 0  ;;  %s31_s23 = sshll.u32 %s555_s1, 4  ;;  %s32_s23 = int_to_ptr.hbm [resolvable:$true] %s31_s23 }
   0x3   :  { %15 = vsyncpa [#allocation10], 0  ;;  %s491_s24 = smov [#allocation5]   ;;  %s21_s28 = sshll.u32 %s554_s0, 4  ;;  %s22_s28 = int_to_ptr.hbm [resolvable:$true] %s21_s28 }
   0x4   :  { %s33_s25 = sshll.u32 %s491_s24, 4  ;;  %s492_s29 = smov 64   ;;  %s34_s25 = int_to_ptr.vmem [resolvable:$true] %s33_s25 }
   0x5   :  { %s493_s30 = smov 4   ;;  %s494_s7 = smov [#allocation2]  }
   0x6   :  { %39 = dma.hbm_to_vmem [thread:$0]  %s32_s23, 1024, %s34_s25, [#allocation6], %s492_s29, %s492_s29, %s493_s30  }
   0x7   :  { %s23_s8 = sshll.u32 %s494_s7, 4  ;;  %s46_s11 = sshll.u32 %s557_s3, 4  ;;  %s24_s8 = int_to_ptr.vmem [resolvable:$true] %s23_s8  ;;  %s47_s11 = int_to_ptr.hbm [resolvable:$true] %s46_s11 }
   0x8   :  { %26 = dma.hbm_to_vmem [thread:$0]  %s22_s28, 128, %s24_s8, [#allocation3]  }
   0x9   :  { %s495_s1 = smov [#allocation7]  }
   0xa   :  { %s48_s12 = sshll.u32 %s495_s1, 4  ;;  %s49_s12 = int_to_ptr.vmem [resolvable:$true] %s48_s12 }
   0xb   :  { %54 = dma.hbm_to_vmem [thread:$0]  %s47_s11, 1024, %s49_s12, [#allocation6], %s492_s29, %s492_s29, %s493_s30  }
   0xc   :  { %483 = dma.done.wait [#allocation3], 128  }
   0xd   :  { %484 = vsyncadd [#allocation3], 4294967168 }
   0xe   :  { %485 = dma.done.wait [#allocation6], 2048  }
   0xf   :  { %486 = vsyncadd [#allocation6], 4294965248  ;;  %v345_v0 = vld [vmem:[#allocation5 + $0x38] sm:$0xff]  ;;  %v344_v1 = vld [vmem:[#allocation5 + $0x30] sm:$0xff]  ;;  %vm154_vm0 = vcmask 519168   ;;  %s496_s13 = smov [#allocation8]  }
  0x10   :  { %139 = vmatpush.bf16.msra.mxu0 %v345_v0  ;;  %v353_v2 = vld [vmem:[#allocation7 + $0x38] sm:$0xff]  ;;  %v352_v3 = vld [vmem:[#allocation7 + $0x30] sm:$0xff]  ;;  %v343_v4 = vld [vmem:[#allocation5 + $0x28] sm:$0xff]  ;;  %s245_s14 = sshll.u32 %s496_s13, 4  ;;  %s247_s17 = sshll.u32 %s559_s5, 4  ;;  %vm238_vm1 = vcmask 125952   ;;  %s246_s14 = int_to_ptr.vmem [resolvable:$true] %s245_s14  ;;  %s248_s17 = int_to_ptr.hbm [resolvable:$true] %s247_s17 }
  0x11   :  { %224 = vmatpush.bf16.msra.mxu1 %v353_v2  ;;  %v351_v5 = vld [vmem:[#allocation7 + $0x28] sm:$0xff]  ;;  %v342_v6 = vld [vmem:[#allocation5 + $0x20] sm:$0xff]  ;;  %v341_v8 = vld [vmem:[#allocation5 + $0x18] sm:$0xff]  ;;  %s258_s23 = sshll.u32 %s560_s6, 4  ;;  %s259_s23 = int_to_ptr.hbm [resolvable:$true] %s258_s23 }
  0x12   :  { %v350_v7 = vld [vmem:[#allocation7 + $0x20] sm:$0xff]  ;;  %v349_v9 = vld [vmem:[#allocation7 + $0x18] sm:$0xff]  ;;  %v340_v10 = vld [vmem:[#allocation5 + $0x10] sm:$0xff] }
  0x13   :  { %v348_v11 = vld [vmem:[#allocation7 + $0x10] sm:$0xff]  ;;  %v339_v12 = vld [vmem:[#allocation5 + $0x8] sm:$0xff]  ;;  %v338_v13 = vld [vmem:[#allocation5] sm:$0xff] }
  0x14   :  { %140 = vmatpush.bf16.msra.mxu0 %v344_v1  ;;  %v69_v14 = vld [vmem:[#allocation2] sm:$0xff]  ;;  %v347_v16 = vld [vmem:[#allocation7 + $0x8] sm:$0xff]  ;;  %v346_v17 = vld [vmem:[#allocation7] sm:$0xff] }
  0x15   :  { %225 = vmatpush.bf16.msra.mxu1 %v352_v3  ;;  %v70_v15 = vpack.c.bf16 %v69_v14, %v69_v14  ;;  %v361_v18 = vld [vmem:[%s556_s2] ss:$0 sm:$0xff]  ;;  %s497_s2 = smov [#allocation9]  }
  0x16   :  { %v362_v24 = vld [vmem:[%s558_s4] ss:$0 sm:$0xff]  ;;  %s256_s20 = sshll.u32 %s497_s2, 4  ;;  %s257_s20 = int_to_ptr.vmem [resolvable:$true] %s256_s20 }
  0x18   :  { %141 = vmatpush.bf16.msra.mxu0 %v343_v4 }
  0x19   :  { %226 = vmatpush.bf16.msra.mxu1 %v351_v5 }
  0x1c   :  { %142 = vmatpush.bf16.msra.mxu0 %v342_v6 }
  0x1d   :  { %227 = vmatpush.bf16.msra.mxu1 %v350_v7 }
  0x20   :  { %143 = vmatpush.bf16.msra.mxu0 %v341_v8 }
  0x21   :  { %228 = vmatpush.bf16.msra.mxu1 %v349_v9 }
  0x24   :  { %144 = vmatpush.bf16.msra.mxu0 %v340_v10 }
  0x25   :  { %229 = vmatpush.bf16.msra.mxu1 %v348_v11 }
  0x28   :  { %145 = vmatpush.bf16.msra.mxu0 %v339_v12 }
  0x29   :  { %230 = vmatpush.bf16.msra.mxu1 %v347_v16 }
  0x2c   :  { %146 = vmatpush.bf16.msra.mxu0 %v338_v13 }
  0x2d   :  { %231 = vmatpush.bf16.msra.mxu1 %v346_v17 }
  0x2f   :  { %147 = vmatmul.bf16.vlgmr.msra.gmra.mxu0 %v70_v15 }
  0xac   :  { %v148_v19 = vpop.f32.mrf.mxu0 }
  0xad   :  { %v149_v20 = vadd.f32 %v361_v18, %v148_v19 }
  0xaf   :  { %v152_v21 = vmax.f32 %v149_v20, 0.0 }
  0xb1   :  { %v153_v22 = vpack.c.bf16 %v152_v21, %v152_v21 }
  0xb3   :  { %232 = vmatmul.bf16.vlgmr.msra.gmra.mxu1 %v153_v22  ;;  %155 = vst.msk [vmem:[#allocation8] sm:$0xf] %vm154_vm0, %v153_v22 }
  0xb4   :  { %v150_v23 = vpop.f32.mrf.mxu0  ;;  %250 = dma.vmem_to_hbm [thread:$0]  %s246_s14, 64, %s248_s17, [#allocation4]  }
 0x130   :  { %v233_v25 = vpop.f32.mrf.mxu1 }
 0x131   :  { %v234_v26 = vadd.f32 %v362_v24, %v233_v25 }
 0x133   :  { %v237_v27 = vpack.c.bf16 %v234_v26, %v234_v26 }
 0x135   :  { %239 = vst.msk [vmem:[#allocation9] sm:$0xf] %vm238_vm1, %v237_v27 }
 0x136   :  { %261 = dma.vmem_to_hbm [thread:$0]  %s257_s20, 64, %s259_s23, [#allocation10]  }
 0x138   :  { %v235_v28 = vpop.f32.mrf.mxu1 }
 0x139   :  { %487 = dma.done.wait [#allocation4], 64  }
 0x13a   :  { %488 = vsyncadd [#allocation4], 4294967232 }
 0x13b   :  { %489 = dma.done.wait [#allocation10], 64  }
 0x13c   :  { %490 = vsyncadd [#allocation10], 4294967232 }
 0x13d   :  { %270 = vsyncpa [#allocation3], 1 }
 0x13e   :  { %271 = vsyncpa [#allocation6], 1 }
 0x13f   :  { %272 = vsyncpa [#allocation4], 1 }
 0x140   :  { %273 = vsyncpa [#allocation10], 1 }

</bundles_post_ra>
